<compile_context>
chip_gen: v7x
topology: tpu7x:2x2x1
jax: 0.10.0
libtpu: 0.0.40
codegen_flags: <defaults>
</compile_context>

<pallas_src>
import functools

import numpy as np
import jax
import jax.numpy as jnp
from jax.experimental import pallas as pl
from jax.experimental.pallas import tpu as pltpu

EPS = 1e-5


# ----------------------------------------------------------------------------
# host-side weight prep (glue, runs once)
# ----------------------------------------------------------------------------
def _band_weights(w_taps, W, Wp):
    """(3, 3, Cin, Cout) tap weights -> (3, Wp*Cin, W*Cout) block-banded
    matrices (one per vertical tap dh).  With activations laid out as
    (rows, Wp*Cin), a 3x3 conv is then just 3 accumulated matmuls; the three
    horizontal taps live in the band structure."""
    _, _, Cin, Cout = w_taps.shape
    B = np.zeros((3, Wp * Cin, W * Cout), np.float32)
    for dh in range(3):
        for dw in range(3):
            blk = w_taps[dh, dw]                                  # (Cin, Cout)
            for w in range(W):
                wp = w + dw
                B[dh, wp * Cin:(wp + 1) * Cin, w * Cout:(w + 1) * Cout] = blk
    return B


# ----------------------------------------------------------------------------
# kernels
# ----------------------------------------------------------------------------
def conv_band_kernel(x_ref, wb_ref, acc_ref, stats_ref, *, H):
    """One image block: 3x3 conv as 3 banded matmuls (bf16 in, f32 acc) plus
    BatchNorm partial sums (ones-row matmul -> rides the idle MXU)."""
    acc = jnp.zeros(acc_ref.shape, jnp.float32)
    for dh in range(3):                      # vertical taps = sublane row offsets
        a = x_ref[dh:dh + H, :].astype(jnp.bfloat16)              # (H, Wp*Cin)
        acc = acc + jnp.dot(a, wb_ref[dh], preferred_element_type=jnp.float32)
    acc_ref[...] = acc
    ones = jnp.ones((1, H), jnp.float32)
    stats_ref[0:1, :] = jnp.dot(ones, acc, preferred_element_type=jnp.float32)
    stats_ref[1:2, :] = jnp.dot(ones, acc * acc, preferred_element_type=jnp.float32)


def bn_relu_conv_band_kernel(acc1_ref, scale_ref, shift_ref, wb_ref,
                             acc2_ref, stats_ref, hpad_ref, *, H, W, Cout):
    """One image block: apply BN1 scale/shift + ReLU (f32), halo-pad into a
    VMEM scratch (only the halo is zeroed), then 3x3 conv as 3 banded matmuls
    with bf16 MXU operands + BN2 partial sums."""
    Hp = H + 2
    WC = W * Cout
    WpC = (W + 2) * Cout

    h1 = jnp.maximum(acc1_ref[...] * scale_ref[...] + shift_ref[...], 0.0)

    # zero only the 1-pixel halo, then write the interior (lane-dense rows)
    zrow = jnp.zeros((1, WpC), jnp.float32)
    hpad_ref[0:1, :] = zrow
    hpad_ref[Hp - 1:Hp, :] = zrow
    zcol = jnp.zeros((H, Cout), jnp.float32)
    hpad_ref[1:H + 1, 0:Cout] = zcol
    hpad_ref[1:H + 1, WpC - Cout:WpC] = zcol
    hpad_ref[1:H + 1, Cout:Cout + WC] = h1

    acc = jnp.zeros(acc2_ref.shape, jnp.float32)
    for dh in range(3):
        a = hpad_ref[dh:dh + H, :].astype(jnp.bfloat16)           # (H, Wp*Cout)
        acc = acc + jnp.dot(a, wb_ref[dh], preferred_element_type=jnp.float32)
    acc2_ref[...] = acc
    ones = jnp.ones((1, H), jnp.float32)
    stats_ref[0:1, :] = jnp.dot(ones, acc, preferred_element_type=jnp.float32)
    stats_ref[1:2, :] = jnp.dot(ones, acc * acc, preferred_element_type=jnp.float32)


def bn_relu_kernel(acc_ref, scale_ref, shift_ref, out_ref):
    out_ref[...] = jnp.maximum(acc_ref[...] * scale_ref[...] + shift_ref[...], 0.0)


# ----------------------------------------------------------------------------
# wrapper
# ----------------------------------------------------------------------------
def _bn_affine(stats, gamma, beta, nhw, W):
    """Reduce per-block (sum, sum_sq) partials -> lane-dense scale/shift rows."""
    Cout = gamma.shape[0]
    s = stats[:, 0, :].sum(axis=0).reshape(W, Cout).sum(axis=0)
    q = stats[:, 1, :].sum(axis=0).reshape(W, Cout).sum(axis=0)
    mean = s / nhw
    var = jnp.maximum(q / nhw - mean * mean, 0.0)   # clamp: cancellation guard
    scale = gamma * jax.lax.rsqrt(var + EPS)
    shift = beta - mean * scale
    return jnp.tile(scale, W)[None, :], jnp.tile(shift, W)[None, :]


def inconv_forward(x_nchw, params):
    """x_nchw: (N, Cin, H, W) float32.  Returns (N, Cout, H, W)."""
    w1, b1, g1, be1, w2, b2, g2, be2 = params        # biases cancelled by batch-stat BN
    N, Cin, H, W = x_nchw.shape
    Cout = w1.shape[-1]
    Hp, Wp = H + 2, W + 2
    nhw = float(N * H * W)

    # ---- host-side layout glue (not the hot path) ---------------------------
    x = jnp.transpose(x_nchw, (0, 2, 3, 1)).astype(jnp.float32)
    xpad = jnp.pad(x, ((0, 0), (1, 1), (1, 1), (0, 0)))
    xpad2d = xpad.reshape(N, Hp, Wp * Cin)           # lane-dense: rows x (Wp*Cin)

    w1b = jnp.asarray(_band_weights(
        np.asarray(w1, np.float32).reshape(3, 3, Cin, Cout), W, Wp)).astype(jnp.bfloat16)
    w2b = jnp.asarray(_band_weights(
        np.asarray(w2, np.float32).reshape(3, 3, Cout, Cout), W, Wp)).astype(jnp.bfloat16)

    par = pltpu.CompilerParams(dimension_semantics=("parallel",))

    def img_in(shape):      # one image block per grid step, leading dim squeezed
        return pl.BlockSpec((None,) + shape, lambda n: (n,) + (0,) * len(shape))

    def full(arr):          # whole (small) array resident in VMEM
        return pl.BlockSpec(arr.shape, lambda n: (0,) * arr.ndim)

    # ---- phase 1: conv1 + BN1 partial sums ----------------------------------
    acc1, stats1 = pl.pallas_call(
        functools.partial(conv_band_kernel, H=H),
        grid=(N,),
        in_specs=[img_in((Hp, Wp * Cin)), full(w1b)],
        out_specs=[img_in((H, W * Cout)), img_in((2, W * Cout))],
        out_shape=[jax.ShapeDtypeStruct((N, H, W * Cout), jnp.float32),
                   jax.ShapeDtypeStruct((N, 2, W * Cout), jnp.float32)],
        compiler_params=par,
    )(xpad2d, w1b)
    scale1, shift1 = _bn_affine(stats1, g1, be1, nhw, W)

    # ---- phase 2: BN1 + ReLU -> conv2 + BN2 partial sums --------------------
    acc2, stats2 = pl.pallas_call(
        functools.partial(bn_relu_conv_band_kernel, H=H, W=W, Cout=Cout),
        grid=(N,),
        in_specs=[img_in((H, W * Cout)), full(scale1), full(shift1), full(w2b)],
        out_specs=[img_in((H, W * Cout)), img_in((2, W * Cout))],
        out_shape=[jax.ShapeDtypeStruct((N, H, W * Cout), jnp.float32),
                   jax.ShapeDtypeStruct((N, 2, W * Cout), jnp.float32)],
        scratch_shapes=[pltpu.VMEM((Hp, Wp * Cout), jnp.float32)],
        compiler_params=par,
    )(acc1, scale1, shift1, w2b)
    scale2, shift2 = _bn_affine(stats2, g2, be2, nhw, W)

    # ---- phase 3: BN2 + ReLU -------------------------------------------------
    y2d = pl.pallas_call(
        bn_relu_kernel,
        grid=(N,),
        in_specs=[img_in((H, W * Cout)), full(scale2), full(shift2)],
        out_specs=img_in((H, W * Cout)),
        out_shape=jax.ShapeDtypeStruct((N, H, W * Cout), jnp.float32),
        compiler_params=par,
    )(acc2, scale2, shift2)

    y = y2d.reshape(N, H, W, Cout)
    return jnp.transpose(y, (0, 3, 1, 2))            # back to NCHW


# ----------------------------------------------------------------------------
# params + pure-JAX reference (mirrors the PyTorch module, f32, incl. bias)
# ----------------------------------------------------------------------------
def make_params(key, in_ch, out_ch):
    ks = jax.random.split(key, 8)
    # weights stored as (tap=9, Cin, Cout); tap index = 3*dh + dw
    w1 = 0.1 * jax.random.normal(ks[0], (9, in_ch, out_ch), jnp.float32)
    b1 = 0.1 * jax.random.normal(ks[1], (out_ch,), jnp.float32)
    g1 = 1.0 + 0.1 * jax.random.normal(ks[2], (out_ch,), jnp.float32)
    be1 = 0.1 * jax.random.normal(ks[3], (out_ch,), jnp.float32)
    w2 = 0.1 * jax.random.normal(ks[4], (9, out_ch, out_ch), jnp.float32)
    b2 = 0.1 * jax.random.normal(ks[5], (out_ch,), jnp.float32)
    g2 = 1.0 + 0.1 * jax.random.normal(ks[6], (out_ch,), jnp.float32)
    be2 = 0.1 * jax.random.normal(ks[7], (out_ch,), jnp.float32)
    return (w1, b1, g1, be1, w2, b2, g2, be2)


def reference_forward(x_nchw, params):
    w1, b1, g1, be1, w2, b2, g2, be2 = params

    def conv(x, w, b):
        w_oihw = jnp.transpose(w.reshape(3, 3, w.shape[1], w.shape[2]), (3, 2, 0, 1))
        y = jax.lax.conv_general_dilated(
            x, w_oihw, window_strides=(1, 1), padding=((1, 1), (1, 1)),
            dimension_numbers=("NCHW", "OIHW", "NCHW"))
        return y + b[None, :, None, None]

    def bn(x, g, be):
        mean = x.mean(axis=(0, 2, 3), keepdims=True)
        var = ((x - mean) ** 2).mean(axis=(0, 2, 3), keepdims=True)
        return (x - mean) * jax.lax.rsqrt(var + EPS) * g[None, :, None, None] \
            + be[None, :, None, None]

    h = jax.nn.relu(bn(conv(x_nchw, w1, b1), g1, be1))
    return jax.nn.relu(bn(conv(h, w2, b2), g2, be2))


if __name__ == "__main__":
    key = jax.random.PRNGKey(0)
    k_x, k_p = jax.random.split(key)

    N, IN_CH, OUT_CH, H, W = 2, 4, 8, 16, 16
    x = jax.random.normal(k_x, (N, IN_CH, H, W), jnp.float32)
    params = make_params(k_p, IN_CH, OUT_CH)

    y = jax.block_until_ready(inconv_forward(x, params))
    y_ref = jax.block_until_ready(reference_forward(x, params))

    assert y.shape == (N, OUT_CH, H, W)
    err = jnp.abs(y - y_ref)
    # bf16 MXU operands -> tolerance is looser than the previous all-f32 version
    assert float(err.max()) < 1.5e-1 and float(err.mean()) < 2.5e-2, \
        f"max abs err {float(err.max())}, mean abs err {float(err.mean())}"

    print("KERNEL_OK")
</pallas_src>

<mosaic_0001>
module attributes {stable_mosaic.version = 11 : i64} {
  func.func @conv_band_kernel(%arg0: i32, %arg1: memref<1x18x72xf32, #tpu.memory_space<vmem>>, %arg2: memref<3x72x128xbf16, #tpu.memory_space<vmem>>, %arg3: memref<1x16x128xf32, #tpu.memory_space<vmem>>, %arg4: memref<1x2x128xf32, #tpu.memory_space<vmem>>) attributes {dimension_semantics = [#tpu.dimension_semantics<parallel>], iteration_bounds = array<i64: 2>, scalar_prefetch = 0 : i64, scratch_operands = 0 : i64, tpu.core_type = #tpu.core_type<tc>, window_params = [{transform_indices = @transform_0, window_bounds = array<i64: 1, 18, 72>}, {pipeline_mode = #tpu.pipeline_mode<synchronous>, transform_indices = @transform_1, window_bounds = array<i64: 3, 72, 128>}, {transform_indices = @transform_2, window_bounds = array<i64: 1, 16, 128>}, {transform_indices = @transform_3, window_bounds = array<i64: 1, 2, 128>}]} {
    %cst = arith.constant 0.000000e+00 : f32
    %0 = vector.broadcast %cst : f32 to vector<16x128xf32>
    %c0 = arith.constant 0 : index
    %c0_0 = arith.constant 0 : index
    %c0_1 = arith.constant 0 : index
    %1 = vector.load %arg1[%c0, %c0_0, %c0_1] : memref<1x18x72xf32, #tpu.memory_space<vmem>>, vector<1x16x72xf32>
    %2 = vector.shape_cast %1 : vector<1x16x72xf32> to vector<16x72xf32>
    %3 = arith.truncf %2 : vector<16x72xf32> to vector<16x72xbf16>
    %c0_2 = arith.constant 0 : index
    %c0_3 = arith.constant 0 : index
    %c0_4 = arith.constant 0 : index
    %4 = vector.load %arg2[%c0_2, %c0_3, %c0_4] : memref<3x72x128xbf16, #tpu.memory_space<vmem>>, vector<1x72x128xbf16>
    %5 = vector.shape_cast %4 : vector<1x72x128xbf16> to vector<72x128xbf16>
    %cst_5 = arith.constant dense<0.000000e+00> : vector<16x128xf32>
    %6 = tpu.matmul %3, %5, %cst_5 {dimension_numbers = #tpu.dot_dimension_numbers<[1], [0], [0], [1], [0, 0, 1, 1], [], []>} : vector<16x72xbf16>, vector<72x128xbf16>, vector<16x128xf32> -> vector<16x128xf32>
    %7 = arith.addf %0, %6 : vector<16x128xf32>
    %c0_6 = arith.constant 0 : index
    %c1 = arith.constant 1 : index
    %c0_7 = arith.constant 0 : index
    %8 = vector.load %arg1[%c0_6, %c1, %c0_7] : memref<1x18x72xf32, #tpu.memory_space<vmem>>, vector<1x16x72xf32>
    %9 = vector.shape_cast %8 : vector<1x16x72xf32> to vector<16x72xf32>
    %10 = arith.truncf %9 : vector<16x72xf32> to vector<16x72xbf16>
    %c1_8 = arith.constant 1 : index
    %c0_9 = arith.constant 0 : index
    %c0_10 = arith.constant 0 : index
    %11 = vector.load %arg2[%c1_8, %c0_9, %c0_10] : memref<3x72x128xbf16, #tpu.memory_space<vmem>>, vector<1x72x128xbf16>
    %12 = vector.shape_cast %11 : vector<1x72x128xbf16> to vector<72x128xbf16>
    %cst_11 = arith.constant dense<0.000000e+00> : vector<16x128xf32>
    %13 = tpu.matmul %10, %12, %cst_11 {dimension_numbers = #tpu.dot_dimension_numbers<[1], [0], [0], [1], [0, 0, 1, 1], [], []>} : vector<16x72xbf16>, vector<72x128xbf16>, vector<16x128xf32> -> vector<16x128xf32>
    %14 = arith.addf %7, %13 : vector<16x128xf32>
    %c0_12 = arith.constant 0 : index
    %c2 = arith.constant 2 : index
    %c0_13 = arith.constant 0 : index
    %15 = vector.load %arg1[%c0_12, %c2, %c0_13] : memref<1x18x72xf32, #tpu.memory_space<vmem>>, vector<1x16x72xf32>
    %16 = vector.shape_cast %15 : vector<1x16x72xf32> to vector<16x72xf32>
    %17 = arith.truncf %16 : vector<16x72xf32> to vector<16x72xbf16>
    %c2_14 = arith.constant 2 : index
    %c0_15 = arith.constant 0 : index
    %c0_16 = arith.constant 0 : index
    %18 = vector.load %arg2[%c2_14, %c0_15, %c0_16] : memref<3x72x128xbf16, #tpu.memory_space<vmem>>, vector<1x72x128xbf16>
    %19 = vector.shape_cast %18 : vector<1x72x128xbf16> to vector<72x128xbf16>
    %cst_17 = arith.constant dense<0.000000e+00> : vector<16x128xf32>
    %20 = tpu.matmul %17, %19, %cst_17 {dimension_numbers = #tpu.dot_dimension_numbers<[1], [0], [0], [1], [0, 0, 1, 1], [], []>} : vector<16x72xbf16>, vector<72x128xbf16>, vector<16x128xf32> -> vector<16x128xf32>
    %21 = arith.addf %14, %20 : vector<16x128xf32>
    %c0_18 = arith.constant 0 : index
    %c0_19 = arith.constant 0 : index
    %c0_20 = arith.constant 0 : index
    %22 = vector.load %arg3[%c0_18, %c0_19, %c0_20] : memref<1x16x128xf32, #tpu.memory_space<vmem>>, vector<1x16x128xf32>
    %23 = vector.shape_cast %22 : vector<1x16x128xf32> to vector<16x128xf32>
    %24 = vector.shape_cast %21 : vector<16x128xf32> to vector<1x16x128xf32>
    tpu.vector_store %arg3[%c0_18, %c0_19, %c0_20], %24 {strides = array<i32>} : memref<1x16x128xf32, #tpu.memory_space<vmem>>, vector<1x16x128xf32>,
    %cst_21 = arith.constant 1.000000e+00 : f32
    %25 = vector.broadcast %cst_21 : f32 to vector<1x16xf32>
    %cst_22 = arith.constant dense<0.000000e+00> : vector<1x128xf32>
    %26 = tpu.matmul %25, %21, %cst_22 {dimension_numbers = #tpu.dot_dimension_numbers<[1], [0], [0], [1], [0, 0, 1, 1], [], []>} : vector<1x16xf32>, vector<16x128xf32>, vector<1x128xf32> -> vector<1x128xf32>
    %c0_23 = arith.constant 0 : index
    %c0_24 = arith.constant 0 : index
    %c0_25 = arith.constant 0 : index
    %27 = vector.load %arg4[%c0_23, %c0_24, %c0_25] : memref<1x2x128xf32, #tpu.memory_space<vmem>>, vector<1x1x128xf32>
    %28 = vector.shape_cast %27 : vector<1x1x128xf32> to vector<1x128xf32>
    %29 = vector.shape_cast %26 : vector<1x128xf32> to vector<1x1x128xf32>
    tpu.vector_store %arg4[%c0_23, %c0_24, %c0_25], %29 {strides = array<i32>} : memref<1x2x128xf32, #tpu.memory_space<vmem>>, vector<1x1x128xf32>,
    %30 = arith.mulf %21, %21 : vector<16x128xf32>
    %cst_26 = arith.constant dense<0.000000e+00> : vector<1x128xf32>
    %31 = tpu.matmul %25, %30, %cst_26 {dimension_numbers = #tpu.dot_dimension_numbers<[1], [0], [0], [1], [0, 0, 1, 1], [], []>} : vector<1x16xf32>, vector<16x128xf32>, vector<1x128xf32> -> vector<1x128xf32>
    %c0_27 = arith.constant 0 : index
    %c1_28 = arith.constant 1 : index
    %c0_29 = arith.constant 0 : index
    %32 = vector.load %arg4[%c0_27, %c1_28, %c0_29] : memref<1x2x128xf32, #tpu.memory_space<vmem>>, vector<1x1x128xf32>
    %33 = vector.shape_cast %32 : vector<1x1x128xf32> to vector<1x128xf32>
    %34 = vector.shape_cast %31 : vector<1x128xf32> to vector<1x1x128xf32>
    tpu.vector_store %arg4[%c0_27, %c1_28, %c0_29], %34 {strides = array<i32>} : memref<1x2x128xf32, #tpu.memory_space<vmem>>, vector<1x1x128xf32>,
    return
  }
  func.func @transform_0(%arg0: i32) -> (i32, i32, i32) {
    %c0_i32 = arith.constant 0 : i32
    %c0_i32_0 = arith.constant 0 : i32
    %c0_i32_1 = arith.constant 0 : i32
    return %arg0, %c0_i32, %c0_i32_0 : i32, i32, i32
  }
  func.func @transform_1(%arg0: i32) -> (i32, i32, i32) {
    %c0_i32 = arith.constant 0 : i32
    %c0_i32_0 = arith.constant 0 : i32
    %c0_i32_1 = arith.constant 0 : i32
    %c0_i32_2 = arith.constant 0 : i32
    return %c0_i32, %c0_i32_0, %c0_i32_1 : i32, i32, i32
  }
  func.func @transform_2(%arg0: i32) -> (i32, i32, i32) {
    %c0_i32 = arith.constant 0 : i32
    %c0_i32_0 = arith.constant 0 : i32
    %c0_i32_1 = arith.constant 0 : i32
    return %arg0, %c0_i32, %c0_i32_0 : i32, i32, i32
  }
  func.func @transform_3(%arg0: i32) -> (i32, i32, i32) {
    %c0_i32 = arith.constant 0 : i32
    %c0_i32_0 = arith.constant 0 : i32
    %c0_i32_1 = arith.constant 0 : i32
    return %arg0, %c0_i32, %c0_i32_0 : i32, i32, i32
  }
}

</mosaic_0001>

<bundles_post_ra>
// kernel: tpu_custom_call.1
= control target key start
LH: loop header
LB: loop body
LE: loop exit
PB: predicated region body
PF: predicated region fallthrough
CT: control target
= control target key end

     0   :  { %9 = vsyncpa [#allocation3], 0  ;;  %s1326_s0 = inlined_call_operand.vmem [shape: f32[2,18,72], index: 0, kind: input, shape index: {}]   ;;  %s1327_s1 = inlined_call_operand.hbm [shape: bf16[3,72,128], index: 1, kind: input, shape index: {}]   ;;  %s1328_s2 = inlined_call_operand.hbm [shape: f32[2,16,128], index: 2, kind: output, shape index: {0}]   ;;  %s1329_s3 = inlined_call_operand.hbm [shape: f32[2,2,128], index: 3, kind: output, shape index: {1}]  }
   0x1   :  { %10 = vsyncpa [#allocation4], 0 }
   0x2   :  { %12 = vsyncpa [#allocation4 + $0x1], 0 }
   0x3   :  { %13 = vsyncpa [#allocation7], 0 }
   0x4   :  { %15 = vsyncpa [#allocation7 + $0x1], 0  ;;  %s1115_s12 = smov 0   ;;  %s1117_s13 = smov 0  }
   0x5   :  { %s1119_s14 = smov 0   ;;  %s1121_s15 = smov 0  }
   0x6 LB: > { %s1136_s16 = sadd.s32 4294967295, %s1082_s15   ;;  %s748_s17 = sadd.s32 4294967294, %s1082_s15   ;;  %s1082_s15 = sphi %s1121_s15, %s1345_s15   ;;  %s1078_s14 = sphi %s1119_s14, %s1344_s14   ;;  %s1074_s13 = sphi %s1117_s13, %s1343_s13   ;;  %s1070_s12 = sphi %s1115_s12, %s1342_s12  }
   0x7   : > { %s1140_s18 = sadd.s32 1, %s1082_s15   ;;  %s75_s19 = sadd.s32 1, %s1078_s14 }
   0x8   : > { %s72_s20 = ssub.s32 %s1082_s15, %s1140_s18  ;;  %p85_p0 = scmp.ne.s32.totalorder %s1078_s14, %s1074_s13 }
   0x9   : > { %p73_p1 = scmp.eq.s32.totalorder %s72_s20, 0  ;;  %p86_p2 = scmp.eq.s32.totalorder %s1136_s16, 1 }
   0xa   : > { %p91_p3 = scmp.ne.s32.totalorder %s1074_s13, %s1070_s12  ;;  %p92_p4 = scmp.eq.s32.totalorder %s748_s17, 1 }
   0xb   : > { %s1151_s21 = scalar_select %p73_p1, %s1078_s14, %s75_s19  }
   0xc   : > { %p1153_p5 = por %p86_p2, %p85_p0  ;;  %p1157_p6 = por %p92_p4, %p91_p3 }
   0xd   : > { %p749_p7 = scmp.ge.s32.totalorder %s1082_s15, 1  ;;  %p125_p8 = scmp.lt.s32.totalorder %s1082_s15, 3 }
   0xe   : > { %s1333_s22 = scalar_select %p1153_p5, 1, 0 }
   0xf   : > { %s1334_s23 = scalar_select %p1157_p6, 1, 0 }
  0x10   : > { %p1330_p9 = scmp.eq.s32.totalorder %s1136_s16, 0  ;;  %p1164_p10 = pnand %p749_p7, %p125_p8 }
  0x11   : > { %s1084_s25 = smov [#allocation2]   ;;  %s956_s30 = scalar_lea.hbm %s1327_s1, 1728 }
  0x12   : > { %s1335_s24 = scalar_select %p1164_p10, 1, 0 }
  0x13   : > { %s137_s26 = sshll.u32 %s1084_s25, 4  ;;  %p886_p11 = pneg %p1164_p10  ;;  %s138_s26 = int_to_ptr.vmem [resolvable:$true] %s137_s26 }
  0x14   : > { %p957_p13 = scmp.ne.s32.totalorder %s1327_s1, %s956_s30  ;;  %p963_p3 = scmp.lt.u32.totalorder %s956_s30, %s1327_s1 }
  0x15   : > { %p1172_p12 = pnand %p1330_p9, %p886_p11 }
  0x17   : > { %p958_p0 = pneg %p1172_p12 }
  0x19   : > { %p959_p1 = pnand %p958_p0, %p957_p13 }
  0x1b   : > { %p960_p2 = pneg %p959_p1 }
  0x1d   : > { %p965_p4 = pnand %p963_p3, %p960_p2 }
  0x1f   : > { %968 = shalt.err (!%p965_p4)
}
  0x20   : > { %s969_s8 = scalar_lea.vmem %s138_s26, 1728  ;;  %p977_p9 = scmp.lt.s32.totalorder %s138_s26, %s138_s26 }
  0x21   : > { %p970_p7 = scmp.ne.s32.totalorder %s138_s26, %s969_s8  ;;  %p978_p6 = scmp.lt.s32.totalorder %s969_s8, %s969_s8 }
  0x23   : > { %p972_p8 = pnand %p970_p7, %p958_p0  ;;  %p979_p5 = por %p978_p6, %p977_p9 }
  0x25   : > { %p973_p11 = pneg %p972_p8 }
  0x27   : > { %p980_p10 = pnand %p979_p5, %p973_p11 }
  0x29   : > { %983 = shalt.err (!%p980_p10)
}
  0x2a   : > { %s1085_s9 = smov 64   ;;  %s1086_s10 = smov 4  }
  0x2b   : > { %889 = dma.hbm_to_vmem [thread:$0]  (!%p1172_p12), %s1327_s1, 1728, %s138_s26, [#allocation3], %s1085_s9, %s1085_s9, %s1086_s10  }
  0x2c   : > { %p1337_p13 = scmp.ne.s32.totalorder %s1335_s24, 0 }
  0x2d   : > { %p1338_p1 = scmp.eq.s32.totalorder (!%p1337_p13), %s1136_s16, 0 }
  0x2e   : > { %161 = sbr.rel (%p1337_p13) target bundleno = 547 (0x223), region = 28 }
  0x35   : > { %1057 = dma.done.wait (%p1338_p1), [#allocation3], 1728   ;;  %p1339_p0 = pmov %p1338_p1 }
  0x36   : > { %v1087_v0 = vmov 0.0   ;;  %vm1088_vm0 = vmmov 0   ;;  %p190_p5 = scmp.lt.s32.totalorder %s1136_s16, 1  ;;  %v941_v1 = vld [vmem:[#allocation2] sm:$0xff]   ;;  %v942_v2 = vld [vmem:[#allocation2 + $0x8] sm:$0xff]   ;;  %v943_v4 = vld [vmem:[#allocation2 + $0x10] sm:$0xff]  }
  0x37   : > { %1059 = vsyncadd (%p1339_p0), [#allocation3], 4294965568  ;;  %823 = vmatprep.subr.bf16.mxu0 %v1087_v0  ;;  %809 = vmatprep.subr.bf16.mxu1 %v1087_v0  ;;  %v946_v3 = vld [vmem:[#allocation2 + $0x24] sm:$0xff]   ;;  %v948_v5 = vld [vmem:[#allocation2 + $0x2c] sm:$0xff]   ;;  %vm252_vm1 = vcmask 1043456   ;;  %vm248_vm2 = vcmask 588800  }
  0x38   : > { %833 = vmatprep.mubr.msk.bf16.mxu0 %vm1088_vm0, %v1087_v0  ;;  %819 = vmatprep.mubr.msk.bf16.mxu1 %vm1088_vm0, %v1087_v0  ;;  %s191_s19 = scalar_select %p190_p5, %s1136_s16, 1  ;;  %v944_v6 = vld [vmem:[#allocation2 + $0x18] sm:$0xff]   ;;  %v945_v7 = vld [vmem:[#allocation2 + $0x20] ss:$0 sps:$4 sm:$0xff]   ;;  %v954_v13 = vld [vmem:[#allocation2 + $0x44] ss:$0 sps:$4 sm:$0xff]  }
  0x39   : > { %824 = vmatpush3.bf16.msra.mxu0 %v941_v1  ;;  %810 = vmatpush3.bf16.msra.mxu1 %v946_v3  ;;  %v950_v8 = vld [vmem:[#allocation2 + $0x34] sm:$0xff]   ;;  %v328_v11 = vsel %vm252_vm1, %v945_v7, 0  ;;  %v952_v12 = vld [vmem:[#allocation2 + $0x3c] sm:$0xff]   ;;  %v947_v15 = vld [vmem:[#allocation2 + $0x48] sm:$0xff]   ;;  %v254_v18 = vsel %vm252_vm1, %v954_v13, 0  ;;  %v1089_v28 = vmov 0.0|0.0  }
  0x3a   : > { %825 = vmatprep.subr.bf16.mxu0 %v1087_v0  ;;  %s877_s20 = smul.u32 24, %s191_s19  ;;  %811 = vmatprep.subr.bf16.mxu1 %v1087_v0  ;;  %v949_v19 = vld [vmem:[#allocation2 + $0x50] sm:$0xff]   ;;  %v951_v21 = vld [vmem:[#allocation2 + $0x58] sm:$0xff]   ;;  %v953_v22 = vld [vmem:[#allocation2 + $0x60] sm:$0xff]   ;;  %s1241_s27 = sand.u32 1, %s1074_s13   ;;  %vm462_vm3 = vcmask 130048  }
  0x3b   : > { %v955_v23 = vld [vmem:[#allocation2 + $0x68] ss:$0 sps:$4 sm:$0xff]   ;;  %s754_s28 = sshll.u32 %s1241_s27, 4  ;;  %v1090_v43 = vmov 1.0   ;;  %s784_s4 = sshll.u32 %s1136_s16, 8 }
  0x3c   : > { %s1213_s26 = scalar_lea.vmem %s1326_s0, %s877_s20  ;;  %v415_v26 = vsel %vm252_vm1, %v955_v23, 0  ;;  %s182_s29 = scalar_lea.vmem [#allocation5], %s754_s28 }
  0x3d   : > { %826 = vmatpush3.bf16.msra.mxu0 %v942_v2  ;;  %812 = vmatpush3.bf16.msra.mxu1 %v948_v5  ;;  %v196_v9 = vld [vmem:[%s1213_s26] sm:$0xff]  ;;  %v197_v10 = vld [vmem:[%s1213_s26 + $0x8] sm:$0xff]  ;;  %s629_s30 = sshll.u32 %s182_s29, 4  ;;  %s1252_s7 = scalar_lea.hbm %s1328_s2, %s784_s4  ;;  %s1246_s30 = int_to_ptr.vmem [resolvable:$true] %s629_s30 }
  0x3e   : > { %827 = vmatprep.subr.bf16.mxu0 %v1087_v0  ;;  %813 = vmatprep.subr.bf16.mxu1 %v1087_v0  ;;  %v198_v14 = vpack.c.bf16 %v197_v10, %v196_v9  ;;  %v208_v16 = vld [vmem:[%s1213_s26 + $0x1] sm:$0xff]  ;;  %v209_v17 = vld [vmem:[%s1213_s26 + $0x9] sm:$0xff]  ;;  %s611_s8 = scalar_lea.sflag [#allocation4], %s1241_s27  ;;  %s984_s9 = scalar_lea.vmem %s1246_s30, 256 }
  0x3f   : > { %v210_v20 = vpack.c.bf16 %v209_v17, %v208_v16  ;;  %v371_v24 = vld [vmem:[%s1213_s26 + $0x2] sm:$0xff]  ;;  %v372_v25 = vld [vmem:[%s1213_s26 + $0xa] sm:$0xff]  ;;  %p985_p6 = scmp.ne.s32.totalorder %s1246_s30, %s984_s9  ;;  %p1340_p9 = scmp.ne.s32.totalorder %s1333_s22, 0 }
  0x40   : > { %v373_v27 = vpack.c.bf16 %v372_v25, %v371_v24  ;;  %s1091_s10 = smov [#allocation5]  }
  0x41   : > { %828 = vmatpush3.bf16.msra.mxu0 %v943_v4  ;;  %814 = vmatpush3.bf16.msra.mxu1 %v950_v8  ;;  %p986_p10 = pnand %p985_p6, %p1340_p9  ;;  %s988_s11 = sshll.u32 %s1091_s10, 4  ;;  %s989_s11 = int_to_ptr.vmem [resolvable:$false] %s988_s11 }
  0x42   : > { %829 = vmatprep.subr.bf16.mxu0 %v1087_v0  ;;  %815 = vmatprep.subr.bf16.mxu1 %v1087_v0  ;;  %s990_s17 = scalar_lea.vmem %s989_s11, 512  ;;  %p991_p2 = scmp.lt.s32.totalorder %s1246_s30, %s989_s11 }
  0x43   : > { %p987_p12 = pneg %p986_p10  ;;  %p992_p3 = scmp.lt.s32.totalorder %s990_s17, %s984_s9 }
  0x45   : > { %830 = vmatpush3.bf16.msra.mxu0 %v944_v6  ;;  %816 = vmatpush3.bf16.msra.mxu1 %v952_v12  ;;  %p993_p4 = por %p992_p3, %p991_p2 }
  0x46   : > { %831 = vmatprep.subr.bf16.mxu0 %v1087_v0  ;;  %817 = vmatprep.subr.bf16.mxu1 %v1087_v0 }
  0x47   : > { %p994_p7 = pnand %p993_p4, %p987_p12 }
  0x49   : > { %832 = vmatpush3.bf16.msra.mxu0 %v328_v11  ;;  %818 = vmatpush3.bf16.msra.mxu1 %v254_v18 }
  0x4a   : > { %837 = vmatprep.subr.bf16.mxu0 %v1087_v0  ;;  %865 = vmatprep.subr.bf16.mxu1 %v1089_v28 }
  0x4c   : > { %834 = vmatmul.mubr.msk.bf16.vlgmr.msra.gmra.mrb[0].mxu0 %vm248_vm2, %v198_v14  ;;  %820 = vmatmul.mubr.msk.bf16.vlgmr.msra.gmra.mrb[0].mxu1 %vm248_vm2, %v210_v20 }
  0x4d   : > { %838 = vmatpush3.bf16.msra.mxu0 %v947_v15  ;;  %847 = vmatprep.mubr.msk.bf16.mxu0 %vm1088_vm0, %v1087_v0 }
  0x4e   : > { %839 = vmatprep.subr.bf16.mxu0 %v1087_v0  ;;  %855 = vmatprep.mubr.msk.f32.mxu1 %vm1088_vm0, %v1087_v0 }
  0x51   : > { %840 = vmatpush3.bf16.msra.mxu0 %v949_v19 }
  0x52   : > { %841 = vmatprep.subr.bf16.mxu0 %v1087_v0 }
  0x55   : > { %842 = vmatpush3.bf16.msra.mxu0 %v951_v21 }
  0x56   : > { %843 = vmatprep.subr.bf16.mxu0 %v1087_v0 }
  0x59   : > { %844 = vmatpush3.bf16.msra.mxu0 %v953_v22 }
  0x5a   : > { %845 = vmatprep.subr.bf16.mxu0 %v1087_v0 }
  0x5d   : > { %846 = vmatpush3.bf16.msra.mxu0 %v415_v26 }
  0x60   : > { %848 = vmatmul.mubr.msk.bf16.vlgmr.msra.gmra.mrb[0].mxu0 %vm248_vm2, %v373_v27 }
 0x11f   : > { %v290_v29 = vpop.f32.mrb[0].mxu1 }
 0x120   : > { %v821_v30 = vpop.f32.mrb[1].mxu1 }
 0x121   : > { %v293_v31 = vpop.f32.mrb[2].mxu1 }
 0x122   : > { %v822_v32 = vpop.f32.mrb[3].mxu1 }
 0x133   : > { %v451_v33 = vpop.f32.mrb[0].mxu0 }
 0x134   : > { %v871_v34 = vadd.f32 %v451_v33, %v290_v29  ;;  %v849_v35 = vpop.f32.mrb[1].mxu0 }
 0x135   : > { %v454_v36 = vpop.f32.mrb[2].mxu0 }
 0x136   : > { %460 = vst [vmem:[%s182_s29] sm:$0xff] %v871_v34  ;;  %v872_v37 = vadd.f32 %v454_v36, %v293_v31  ;;  %v850_v38 = vpop.f32.mrb[3].mxu0  ;;  %v537_v39 = vmul.f32 %v871_v34, %v871_v34 }
 0x138   : > { %461 = vst [vmem:[%s182_s29 + $0x8] sm:$0xff] %v872_v37  ;;  %v866_v40 = vpack.c.bf16 %v872_v37, %v871_v34  ;;  %v538_v41 = vmul.f32 %v872_v37, %v872_v37 }
 0x13a   : > { %v869_v42 = vpack.c.bf16 %v538_v41, %v537_v39  ;;  %867 = vmatpush3.bf16.msra.mxu1 %v866_v40 }
 0x13b   : > { %868 = vmatprep.subr.bf16.mxu1 %v1089_v28 }
 0x13d   : > { %856 = vmatmul.mubr.msk.f32.vlgmr.msra.gmra.mrb[4].mxu1 %vm462_vm3, %v1090_v43 }
 0x13e   : > { %870 = vmatpush3.bf16.msra.mxu1 %v869_v42  ;;  %862 = vmatprep.mubr.msk.f32.mxu1 %vm1088_vm0, %v1087_v0 }
 0x141   : > { %863 = vmatmul.mubr.msk.f32.vlgmr.msra.gmra.mrb[6].mxu1 %vm462_vm3, %v1090_v43 }
 0x142   : > { %997 = shalt.err (!%p994_p7)
}
 0x143   : > { %s998_s19 = scalar_lea.hbm %s1252_s7, 256  ;;  %s1002_s25 = scalar_lea.hbm %s1328_s2, 512 }
 0x144   : > { %p999_p8 = scmp.ne.s32.totalorder %s1252_s7, %s998_s19  ;;  %p1003_p1 = scmp.lt.u32.totalorder %s1252_s7, %s1328_s2 }
 0x145   : > { %p1004_p0 = scmp.lt.u32.totalorder %s1002_s25, %s998_s19  ;;  %p1006_p6 = scmp.lt.u32.totalorder %s998_s19, %s1252_s7 }
 0x146   : > { %p1000_p11 = pnand %p999_p8, %p1340_p9 }
 0x147   : > { %p1005_p5 = por %p1004_p0, %p1003_p1 }
 0x148   : > { %p1001_p13 = pneg %p1000_p11 }
 0x149   : > { %p1007_p10 = por %p1006_p6, %p1005_p5 }
 0x14b   : > { %p1008_p12 = pnand %p1007_p10, %p1001_p13 }
 0x14d   : > { %1011 = shalt.err (!%p1008_p12)
}
 0x14e   : > { %s1092_s29 = smov 128   ;;  %s1093_s4 = smov 8  }
 0x14f   : > { %882 = dma.vmem_to_hbm [thread:$0]  (%p1340_p9), %s1246_s30, 256, %s1252_s7, %s611_s8, %s1092_s29, %s1092_s29, %s1093_s4  }
 0x150   : > { %s755_s5 = sshll.u32 %s1241_s27, 1  ;;  %s781_s10 = sshll.u32 %s1136_s16, 5 }
 0x151   : > { %s189_s6 = scalar_lea.vmem [#allocation6], %s755_s5  ;;  %s1285_s19 = scalar_lea.hbm %s1329_s3, %s781_s10 }
 0x152   : > { %s645_s9 = sshll.u32 %s189_s6, 4  ;;  %s616_s30 = scalar_lea.sflag [#allocation7], %s1241_s27  ;;  %s1280_s9 = int_to_ptr.vmem [resolvable:$true] %s645_s9 }
 0x153   : > { %s1012_s7 = scalar_lea.vmem %s1280_s9, 32  ;;  %s1094_s16 = smov [#allocation6]  }
 0x154   : > { %p1013_p2 = scmp.ne.s32.totalorder %s1280_s9, %s1012_s7  ;;  %s1016_s8 = sshll.u32 %s1094_s16, 4  ;;  %s1017_s8 = int_to_ptr.vmem [resolvable:$false] %s1016_s8 }
 0x155   : > { %s1018_s20 = scalar_lea.vmem %s1017_s8, 64  ;;  %p1019_p7 = scmp.lt.s32.totalorder %s1280_s9, %s1017_s8 }
 0x156   : > { %p1014_p3 = pnand %p1013_p2, %p1340_p9  ;;  %p1020_p8 = scmp.lt.s32.totalorder %s1018_s20, %s1012_s7 }
 0x158   : > { %p1015_p4 = pneg %p1014_p3  ;;  %p1021_p11 = por %p1020_p8, %p1019_p7 }
 0x15a   : > { %p1022_p13 = pnand %p1021_p11, %p1015_p4 }
 0x210   : > { %v532_v44 = vpop.f32.mrb[4].mxu1 }
 0x211   : > { %536 = vst [vmem:[%s189_s6] sm:$0x1] %v532_v44  ;;  %v857_v45 = vpop.f32.mrb[5].mxu1 }
 0x214   : > { %v605_v46 = vpop.f32.mrb[6].mxu1 }
 0x215   : > { %609 = vst [vmem:[%s189_s6 + $0x1] sm:$0x1] %v605_v46  ;;  %v864_v47 = vpop.f32.mrb[7].mxu1 }
 0x216   : > { %1025 = shalt.err (!%p1022_p13)
}
 0x217   : > { %s1026_s27 = scalar_lea.hbm %s1285_s19, 32  ;;  %s1030_s26 = scalar_lea.hbm %s1329_s3, 64 }
 0x218   : > { %p1027_p1 = scmp.ne.s32.totalorder %s1285_s19, %s1026_s27  ;;  %p1031_p6 = scmp.lt.u32.totalorder %s1285_s19, %s1329_s3 }
 0x219   : > { %p1032_p10 = scmp.lt.u32.totalorder %s1030_s26, %s1026_s27  ;;  %p1034_p2 = scmp.lt.u32.totalorder %s1026_s27, %s1285_s19 }
 0x21a   : > { %p1028_p0 = pnand %p1027_p1, %p1340_p9 }
 0x21b   : > { %p1033_p12 = por %p1032_p10, %p1031_p6 }
 0x21c   : > { %p1029_p5 = pneg %p1028_p0 }
 0x21d   : > { %p1035_p3 = por %p1034_p2, %p1033_p12 }
 0x21f   : > { %p1036_p4 = pnand %p1035_p3, %p1029_p5 }
 0x221   : > { %1039 = shalt.err (!%p1036_p4)
}
 0x222   : > { %883 = dma.vmem_to_hbm [thread:$0]  (%p1340_p9), %s1280_s9, 32, %s1285_s19, %s616_s30  }
 0x223 PF: > { %p899_p7 = scmp.ge.s32.totalorder %s1082_s15, 2  ;;  %s657_s4 = sand.u32 1, %s1070_s12  }
 0x224   : > { %p1341_p8 = scmp.ne.s32.totalorder %s1334_s23, 0  ;;  %s658_s5 = scalar_lea.sflag [#allocation4], %s657_s4 }
 0x226   : > { %p891_p11 = pnand %p899_p7, %p1341_p8 }
 0x228   : > { %1061 = dma.done.wait (!%p891_p11), %s658_s5, 256  }
 0x229   : > { %1063 = vsyncadd (!%p891_p11), %s658_s5, 4294967040  ;;  %s667_s6 = scalar_lea.sflag [#allocation7], %s657_s4 }
 0x22a   : > { %1065 = dma.done.wait (!%p891_p11), %s667_s6, 32  }
 0x22b   : > { %1067 = vsyncadd (!%p891_p11), %s667_s6, 4294967264  ;;  %p18_p9 = scmp.ge.s32.totalorder %s1140_s18, 4   ;;  %s1342_s12 = smov %s1074_s13 }
 0x22c   : > { %s1343_s13 = smov %s1078_s14  ;;  %s1344_s14 = smov %s1151_s21 }
 0x22d   : > { %s1345_s15 = smov %s1140_s18  ;;  %20 = sbr.rel (!%p18_p9) target bundleno = 6 (0x6), region = 87 }
 0x234   :  { %672 = vsyncpa [#allocation3], 1 }
 0x235   :  { %674 = vsyncpa [#allocation3 + $0x1], 1 }
 0x236   :  { %675 = vsyncpa [#allocation4], 1 }
 0x237   :  { %677 = vsyncpa [#allocation4 + $0x1], 1 }
 0x238   :  { %678 = vsyncpa [#allocation7], 1 }
 0x239   :  { %680 = vsyncpa [#allocation7 + $0x1], 1 }

</bundles_post_ra>
